<compile_context>
chip_gen: v7x
topology: tpu7x:2x2x1
jax: 0.10.0
libtpu: 0.0.40
codegen_flags: <defaults>
</compile_context>

<pallas_src>
import functools

import jax
import jax.numpy as jnp
from jax.experimental import pallas as pl
from jax.experimental.pallas import tpu as pltpu


def _pse_kernel(x_ref, w1_ref, b1_ref, w2_ref, b2_ref, o_ref):
    # x_ref : (Nb, C, T)  Nb images, all channels (sublanes), T lanes
    # w1_ref: (Cr, 1)     conv1 weight, pre-scaled by 1/C (folds the mean)
    # b1_ref: (Cr, 1)
    # w2_ref: (C, Cr)     conv2 weight
    # b2_ref: (C, 1)
    x = x_ref[...]                                        # native dtype; do NOT
                                                          # upcast the big slab

    # Hoist parameter loads once per grid step (JAX does not CSE broadcasts).
    w1 = w1_ref[...].astype(jnp.float32)                  # (Cr, 1)
    b1 = b1_ref[...].astype(jnp.float32)                  # (Cr, 1)
    w2 = w2_ref[...].astype(jnp.float32)                  # (C, Cr)
    b2 = b2_ref[...].astype(jnp.float32)                  # (C, 1)
    cr = w2.shape[1]

    # PositionalAveragePooling: channel sum with f32 accumulation (the 1/C is
    # folded into w1).  Reduction is over sublanes only -> garbage in masked
    # OOB lanes of a partial block stays confined to those lanes.
    pooled = jnp.sum(x, axis=1, keepdims=True, dtype=jnp.float32)  # (Nb, 1, T)

    # conv1 (1x1, in=1): broadcast FMA + bias, then ReLU (VPU).
    h = jnp.maximum(w1 * pooled + b1, 0.0)                # (Nb, Cr, T)

    # conv2 (1x1, Cr -> C).  Cr is tiny for typical reductions -> unrolled VPU
    # FMA; keep an MXU path for larger hidden widths.
    if cr <= 8:
        s = b2                                            # (C, 1) broadcasts up
        for k in range(cr):                               # static unroll
            s = s + w2[:, k:k + 1] * h[:, k:k + 1, :]     # -> (Nb, C, T)
    else:
        s = jnp.einsum("ok,nkt->not", w2, h,
                       preferred_element_type=jnp.float32) + b2

    s = jax.nn.sigmoid(s)                                 # f32, EUP

    # Gate in the input dtype: for bf16 inputs the dominant multiply + store
    # stays bf16 (halves vreg/VMEM pressure on v6e/v7x); f32 path unchanged.
    o_ref[...] = x * s.astype(o_ref.dtype)


def _plan_tiles(n, c, hw, itemsize, block_bytes):
    """Pick (nb, hw_tile): batch rows per block and lane-tile width.

    One block is ~block_bytes; with double-buffered in+out the pipeline uses
    ~4*block_bytes of VMEM, which amortizes the ~0.35 us per-step overhead.
    """
    row_bytes = c * itemsize
    lane_budget = max(128, block_bytes // row_bytes)

    if hw > lane_budget:
        # Large feature map: tile the lane (H*W) axis, one image per block.
        # hw_tile is a multiple of 128 (lane-dense stores); a partial last
        # block is masked on writeback (compute is lane-wise independent).
        hw_tile = max(128, lane_budget - lane_budget % 128)
        return 1, hw_tile

    # Small feature map: keep the full H*W on lanes and fold batch into the
    # block so DMAs stay large.
    image_bytes = c * hw * itemsize
    nb = max(1, min(n, block_bytes // image_bytes))
    # Keep >= ~8 grid steps for megacore / v7x dual-TC balance, but never
    # shrink a block below ~512 KiB (per-step overhead dominates below that).
    min_nb = max(1, (512 * 1024) // image_bytes)
    balanced_nb = max(1, n // 8)
    nb = min(nb, max(balanced_nb, min_nb))
    # Largest divisor of N <= nb so every batch block is full (partial leading
    # blocks would also be correct, just masked on writeback).
    while n % nb:
        nb -= 1
    return nb, hw


def _default_block_bytes():
    """Per-slab VMEM budget; larger on v7x (3.2 TB/s HBM needs bigger tiles)."""
    try:
        kind = jax.devices()[0].device_kind.lower()
    except Exception:  # pragma: no cover - defensive
        kind = ""
    if "7" in kind:          # v7x: 2x tile, still << 64 MiB VMEM per TC
        return 4 * 1024 * 1024
    return 2 * 1024 * 1024   # v5e / v6e (and safe fallback)


@functools.partial(jax.jit, static_argnames=("block_bytes",))
def _pse_forward(x, conv1_w, conv1_b, conv2_w, conv2_b, *, block_bytes):
    n, c, h, w = x.shape
    cr = conv1_w.shape[0]
    hw = h * w

    # Free reshape (no data movement): channels on sublanes, H*W on lanes.
    x3 = x.reshape(n, c, hw)

    nb, hw_tile = _plan_tiles(n, c, hw, x.dtype.itemsize, block_bytes)
    num_n = pl.cdiv(n, nb)
    num_hw = pl.cdiv(hw, hw_tile)

    # Fold the 1/C of the channel mean into the conv1 weight (kernel uses sum).
    w1 = conv1_w.reshape(cr, 1) * (1.0 / c)
    b1 = conv1_b.reshape(cr, 1)
    w2 = conv2_w.reshape(c, cr)
    b2 = conv2_b.reshape(c, 1)

    # Double-buffered in+out slabs (4x) + f32 excitation intermediates; keep
    # the limit above v5e's 16 MiB scoped default and under v7x's 64 MiB.
    slab_bytes = nb * c * hw_tile * x.dtype.itemsize
    vmem_limit = int(min(48 * 1024 * 1024, max(32 * 1024 * 1024, 8 * slab_bytes)))

    out3 = pl.pallas_call(
        _pse_kernel,
        out_shape=jax.ShapeDtypeStruct((n, c, hw), x.dtype),
        grid_spec=pltpu.PrefetchScalarGridSpec(
            num_scalar_prefetch=0,
            grid=(num_n, num_hw),
            in_specs=[
                pl.BlockSpec((nb, c, hw_tile), lambda i, j: (i, 0, j)),  # x slab
                pl.BlockSpec((cr, 1), lambda i, j: (0, 0)),              # w1 / C
                pl.BlockSpec((cr, 1), lambda i, j: (0, 0)),              # b1
                pl.BlockSpec((c, cr), lambda i, j: (0, 0)),              # w2
                pl.BlockSpec((c, 1), lambda i, j: (0, 0)),               # b2
            ],
            out_specs=pl.BlockSpec((nb, c, hw_tile), lambda i, j: (i, 0, j)),
        ),
        compiler_params=pltpu.CompilerParams(
            dimension_semantics=("parallel", "parallel"),
            vmem_limit_bytes=vmem_limit,
        ),
    )(x3, w1, b1, w2, b2)

    return out3.reshape(n, c, h, w)


def pse_module(x, conv1_w, conv1_b, conv2_w, conv2_b, *, block_bytes=None):
    """x: (N, C, H, W) NCHW; conv weights in PyTorch layout (out, in, 1, 1)."""
    if block_bytes is None:
        block_bytes = _default_block_bytes()
    return _pse_forward(x, conv1_w, conv1_b, conv2_w, conv2_b,
                        block_bytes=int(block_bytes))


def _pse_reference(x, conv1_w, conv1_b, conv2_w, conv2_b):
    """Pure-JAX reference mirroring the PyTorch forward."""
    p = jnp.mean(x, axis=1, keepdims=True)                         # (N,1,H,W)
    h = jnp.einsum("nihw,oi->nohw", p, conv1_w[:, :, 0, 0]) + conv1_b[None, :, None, None]
    h = jnp.maximum(h, 0.0)
    s = jnp.einsum("nihw,oi->nohw", h, conv2_w[:, :, 0, 0]) + conv2_b[None, :, None, None]
    s = jax.nn.sigmoid(s)
    return x * s


if __name__ == "__main__":
    # Shapes consistent with the module: channels=32, reduction=16 -> hidden=2.
    N, C, H, W = 2, 32, 8, 8
    reduction = 16
    Cr = C // reduction

    key = jax.random.PRNGKey(0)
    kx, k1w, k1b, k2w, k2b = jax.random.split(key, 5)

    x = jax.random.normal(kx, (N, C, H, W), dtype=jnp.float32)
    # Deterministic synthetic parameters (PyTorch conv layout: (out, in, 1, 1)).
    conv1_w = 0.1 * jax.random.normal(k1w, (Cr, 1, 1, 1), dtype=jnp.float32)
    conv1_b = 0.1 * jax.random.normal(k1b, (Cr,), dtype=jnp.float32)
    conv2_w = 0.1 * jax.random.normal(k2w, (C, Cr, 1, 1), dtype=jnp.float32)
    conv2_b = 0.1 * jax.random.normal(k2b, (C,), dtype=jnp.float32)

    # 1) Small-HW path: full H*W on lanes, batch folded into the block.
    out = jax.block_until_ready(pse_module(x, conv1_w, conv1_b, conv2_w, conv2_b))
    ref = _pse_reference(x, conv1_w, conv1_b, conv2_w, conv2_b)
    assert out.shape == x.shape and out.dtype == x.dtype
    assert jnp.allclose(out, ref, atol=1e-5, rtol=1e-5), "mismatch (batched small-HW)"

    # 2) Lane-tiled path with a partial (masked) last lane block: HW=576, tile=256.
    x2 = jax.random.normal(kx, (N, C, 24, 24), dtype=jnp.float32)
    out2 = jax.block_until_ready(
        pse_module(x2, conv1_w, conv1_b, conv2_w, conv2_b, block_bytes=32 * 1024))
    ref2 = _pse_reference(x2, conv1_w, conv1_b, conv2_w, conv2_b)
    assert jnp.allclose(out2, ref2, atol=1e-5, rtol=1e-5), "mismatch (lane-tiled)"

    # 3) Multi-step batch grid on tiny images (nb=2, grid (3, 1)).
    x3 = jax.random.normal(kx, (6, C, 4, 4), dtype=jnp.float32)
    out3 = jax.block_until_ready(
        pse_module(x3, conv1_w, conv1_b, conv2_w, conv2_b, block_bytes=4 * 1024))
    ref3 = _pse_reference(x3, conv1_w, conv1_b, conv2_w, conv2_b)
    assert jnp.allclose(out3, ref3, atol=1e-5, rtol=1e-5), "mismatch (multi-batch-step)"

    # 4) bf16 path: f32 excitation branch, bf16 gate multiply + store.
    xb = x.astype(jnp.bfloat16)
    outb = jax.block_until_ready(pse_module(xb, conv1_w, conv1_b, conv2_w, conv2_b))
    refb = _pse_reference(xb.astype(jnp.float32), conv1_w, conv1_b, conv2_w, conv2_b)
    assert outb.dtype == jnp.bfloat16
    assert jnp.allclose(outb.astype(jnp.float32), refb, atol=3e-2, rtol=3e-2), \
        "mismatch (bf16)"

    print("KERNEL_OK")
</pallas_src>

<mosaic_0001>
module attributes {stable_mosaic.version = 11 : i64} {
  func.func @_pse_kernel(%arg0: i32, %arg1: i32, %arg2: memref<2x32x64xf32, #tpu.memory_space<vmem>>, %arg3: memref<2x1xf32, #tpu.memory_space<vmem>>, %arg4: memref<2x1xf32, #tpu.memory_space<vmem>>, %arg5: memref<32x2xf32, #tpu.memory_space<vmem>>, %arg6: memref<32x1xf32, #tpu.memory_space<vmem>>, %arg7: memref<2x32x64xf32, #tpu.memory_space<vmem>>) attributes {dimension_semantics = [#tpu.dimension_semantics<parallel>, #tpu.dimension_semantics<parallel>], iteration_bounds = array<i64: 1, 1>, scalar_prefetch = 0 : i64, scratch_operands = 0 : i64, tpu.core_type = #tpu.core_type<tc>, window_params = [{transform_indices = @transform_0, window_bounds = array<i64: 2, 32, 64>}, {pipeline_mode = #tpu.pipeline_mode<synchronous>, transform_indices = @transform_1, window_bounds = array<i64: 2, 1>}, {pipeline_mode = #tpu.pipeline_mode<synchronous>, transform_indices = @transform_2, window_bounds = array<i64: 2, 1>}, {pipeline_mode = #tpu.pipeline_mode<synchronous>, transform_indices = @transform_3, window_bounds = array<i64: 32, 2>}, {pipeline_mode = #tpu.pipeline_mode<synchronous>, transform_indices = @transform_4, window_bounds = array<i64: 32, 1>}, {transform_indices = @transform_5, window_bounds = array<i64: 2, 32, 64>}]} {
    %c0 = arith.constant 0 : index
    %c0_0 = arith.constant 0 : index
    %c0_1 = arith.constant 0 : index
    %0 = vector.load %arg2[%c0, %c0_0, %c0_1] : memref<2x32x64xf32, #tpu.memory_space<vmem>>, vector<2x32x64xf32>
    %c0_2 = arith.constant 0 : index
    %c0_3 = arith.constant 0 : index
    %1 = vector.load %arg3[%c0_2, %c0_3] : memref<2x1xf32, #tpu.memory_space<vmem>>, vector<2x1xf32>
    %c0_4 = arith.constant 0 : index
    %c0_5 = arith.constant 0 : index
    %2 = vector.load %arg4[%c0_4, %c0_5] : memref<2x1xf32, #tpu.memory_space<vmem>>, vector<2x1xf32>
    %c0_6 = arith.constant 0 : index
    %c0_7 = arith.constant 0 : index
    %3 = vector.load %arg5[%c0_6, %c0_7] : memref<32x2xf32, #tpu.memory_space<vmem>>, vector<32x2xf32>
    %c0_8 = arith.constant 0 : index
    %c0_9 = arith.constant 0 : index
    %4 = vector.load %arg6[%c0_8, %c0_9] : memref<32x1xf32, #tpu.memory_space<vmem>>, vector<32x1xf32>
    %cst = arith.constant dense<0.000000e+00> : vector<2x64xf32>
    %5 = vector.multi_reduction <add>, %0, %cst [1] : vector<2x32x64xf32> to vector<2x64xf32>
    %6 = vector.shape_cast %5 : vector<2x64xf32> to vector<2x1x64xf32>
    %7 = vector.shape_cast %1 : vector<2x1xf32> to vector<1x2x1xf32>
    %8 = vector.broadcast %7 : vector<1x2x1xf32> to vector<2x2x64xf32>
    %9 = vector.broadcast %6 : vector<2x1x64xf32> to vector<2x2x64xf32>
    %10 = arith.mulf %8, %9 : vector<2x2x64xf32>
    %11 = vector.shape_cast %2 : vector<2x1xf32> to vector<1x2x1xf32>
    %12 = vector.broadcast %11 : vector<1x2x1xf32> to vector<2x2x64xf32>
    %13 = arith.addf %10, %12 : vector<2x2x64xf32>
    %cst_10 = arith.constant 0.000000e+00 : f32
    %14 = vector.broadcast %cst_10 : f32 to vector<2x2x64xf32>
    %15 = arith.maximumf %13, %14 : vector<2x2x64xf32>
    %16 = vector.extract_strided_slice %3 {offsets = [0, 0], sizes = [32, 1], strides = [1, 1]} : vector<32x2xf32> to vector<32x1xf32>
    %17 = vector.extract_strided_slice %15 {offsets = [0, 0, 0], sizes = [2, 1, 64], strides = [1, 1, 1]} : vector<2x2x64xf32> to vector<2x1x64xf32>
    %18 = vector.shape_cast %16 : vector<32x1xf32> to vector<1x32x1xf32>
    %19 = vector.broadcast %18 : vector<1x32x1xf32> to vector<2x32x64xf32>
    %20 = vector.broadcast %17 : vector<2x1x64xf32> to vector<2x32x64xf32>
    %21 = arith.mulf %19, %20 : vector<2x32x64xf32>
    %22 = vector.shape_cast %4 : vector<32x1xf32> to vector<1x32x1xf32>
    %23 = vector.broadcast %22 : vector<1x32x1xf32> to vector<2x32x64xf32>
    %24 = arith.addf %23, %21 : vector<2x32x64xf32>
    %25 = vector.extract_strided_slice %3 {offsets = [0, 1], sizes = [32, 1], strides = [1, 1]} : vector<32x2xf32> to vector<32x1xf32>
    %26 = vector.extract_strided_slice %15 {offsets = [0, 1, 0], sizes = [2, 1, 64], strides = [1, 1, 1]} : vector<2x2x64xf32> to vector<2x1x64xf32>
    %27 = vector.shape_cast %25 : vector<32x1xf32> to vector<1x32x1xf32>
    %28 = vector.broadcast %27 : vector<1x32x1xf32> to vector<2x32x64xf32>
    %29 = vector.broadcast %26 : vector<2x1x64xf32> to vector<2x32x64xf32>
    %30 = arith.mulf %28, %29 : vector<2x32x64xf32>
    %31 = arith.addf %24, %30 : vector<2x32x64xf32>
    %32 = arith.negf %31 : vector<2x32x64xf32>
    %33 = math.exp %32 : vector<2x32x64xf32>
    %cst_11 = arith.constant 1.000000e+00 : f32
    %34 = vector.broadcast %cst_11 : f32 to vector<2x32x64xf32>
    %35 = arith.addf %34, %33 : vector<2x32x64xf32>
    %36 = arith.divf %34, %35 : vector<2x32x64xf32>
    %37 = arith.mulf %0, %36 : vector<2x32x64xf32>
    %c0_12 = arith.constant 0 : index
    %c0_13 = arith.constant 0 : index
    %c0_14 = arith.constant 0 : index
    %38 = vector.load %arg7[%c0_12, %c0_13, %c0_14] : memref<2x32x64xf32, #tpu.memory_space<vmem>>, vector<2x32x64xf32>
    tpu.vector_store %arg7[%c0_12, %c0_13, %c0_14], %37 {strides = array<i32>} : memref<2x32x64xf32, #tpu.memory_space<vmem>>, vector<2x32x64xf32>,
    return
  }
  func.func @transform_0(%arg0: i32, %arg1: i32) -> (i32, i32, i32) {
    %c0_i32 = arith.constant 0 : i32
    %c0_i32_0 = arith.constant 0 : i32
    return %arg0, %c0_i32, %arg1 : i32, i32, i32
  }
  func.func @transform_1(%arg0: i32, %arg1: i32) -> (i32, i32) {
    %c0_i32 = arith.constant 0 : i32
    %c0_i32_0 = arith.constant 0 : i32
    %c0_i32_1 = arith.constant 0 : i32
    return %c0_i32, %c0_i32_0 : i32, i32
  }
  func.func @transform_2(%arg0: i32, %arg1: i32) -> (i32, i32) {
    %c0_i32 = arith.constant 0 : i32
    %c0_i32_0 = arith.constant 0 : i32
    %c0_i32_1 = arith.constant 0 : i32
    return %c0_i32, %c0_i32_0 : i32, i32
  }
  func.func @transform_3(%arg0: i32, %arg1: i32) -> (i32, i32) {
    %c0_i32 = arith.constant 0 : i32
    %c0_i32_0 = arith.constant 0 : i32
    %c0_i32_1 = arith.constant 0 : i32
    return %c0_i32, %c0_i32_0 : i32, i32
  }
  func.func @transform_4(%arg0: i32, %arg1: i32) -> (i32, i32) {
    %c0_i32 = arith.constant 0 : i32
    %c0_i32_0 = arith.constant 0 : i32
    %c0_i32_1 = arith.constant 0 : i32
    return %c0_i32, %c0_i32_0 : i32, i32
  }
  func.func @transform_5(%arg0: i32, %arg1: i32) -> (i32, i32, i32) {
    %c0_i32 = arith.constant 0 : i32
    %c0_i32_0 = arith.constant 0 : i32
    return %arg0, %c0_i32, %arg1 : i32, i32, i32
  }
}

</mosaic_0001>

<bundles_post_ra>
// kernel: _pse_forward.1
= control target key start
LH: loop header
LB: loop body
LE: loop exit
PB: predicated region body
PF: predicated region fallthrough
CT: control target
= control target key end

     0   :  { %v299_v0 = vmov 0   ;;  %v300_v11 = vmov 1   ;;  %vm38_vm0 = vcmask 523264   ;;  %v101_v48 = vlaneseq  ;;  %s457_s3 = inlined_call_operand.vmem [shape: f32[32,2], index: 3, kind: input, shape index: {}]   ;;  %s458_s1 = inlined_call_operand.vmem [shape: f32[2,1], index: 1, kind: input, shape index: {}]   ;;  %s459_s2 = inlined_call_operand.vmem [shape: f32[2,1], index: 2, kind: input, shape index: {}]   ;;  %s460_s4 = inlined_call_operand.vmem [shape: f32[32,1], index: 4, kind: input, shape index: {}]   ;;  %s461_s0 = inlined_call_operand.vmem [shape: f32[2,32,64], index: 0, kind: input, shape index: {}]   ;;  %s462_s5 = inlined_call_operand.vmem [shape: f32[2,32,64], index: 5, kind: output, shape index: {}]  }
   0x1   :  { %264 = vset.pattern.permute.xlu1 %v299_v0  ;;  %263 = vset.pattern.permute.xlu0 %v299_v0  ;;  %v30_v1 = vld [vmem:[%s457_s3] sm:$0xff]  ;;  %v31_v3 = vld [vmem:[%s457_s3 + $0x8] sm:$0xff]  ;;  %v33_v5 = vld [vmem:[%s457_s3 + $0x18] sm:$0xff] }
   0x2   :  { %v28_v2 = vld [vmem:[%s458_s1] sm:$0x3]  ;;  %83 = vperm.xlu1 %264, %v30_v1   ;;  %v32_v6 = vld [vmem:[%s457_s3 + $0x10] sm:$0xff]  ;;  %v35_v7 = vld [vmem:[%s460_s4 + $0x8] sm:$0xff]  ;;  %v102_v53 = vshrl.u32 %v101_v48, 7 }
   0x3   :  { %67 = vperm.xlu0 %263, %v28_v2   ;;  %v29_v4 = vld [vmem:[%s459_s2] sm:$0x3]  ;;  %v37_v9 = vld [vmem:[%s460_s4 + $0x18] sm:$0xff]  ;;  %v36_v10 = vld [vmem:[%s460_s4 + $0x10] sm:$0xff] }
   0x4   :  { %v34_v8 = vld [vmem:[%s460_s4] sm:$0xff]  ;;  %v369_v13 = vld [vmem:[%s461_s0 + $0x8] sm:$0xff]  ;;  %v392_v20 = vld [vmem:[%s461_s0 + $0x10] sm:$0xff]  ;;  %v103_v58 = vsub.s32 0, %v102_v53 }
   0x5   :  { %v364_v12 = vld [vmem:[%s461_s0] sm:$0xff]  ;;  %v379_v15 = vld [vmem:[%s461_s0 + $0x28] sm:$0xff]  ;;  %v40_v17 = vsel %vm38_vm0, %v369_v13, 0.0  ;;  %v397_v21 = vld [vmem:[%s461_s0 + $0x30] sm:$0xff]  ;;  %v42_v24 = vsel %vm38_vm0, %v392_v20, 0.0 }
   0x6   :  { %88 = vperm.xlu1 %264, %v31_v3   ;;  %v374_v14 = vld [vmem:[%s461_s0 + $0x20] sm:$0xff]  ;;  %v39_v16 = vsel %vm38_vm0, %v364_v12, 0.0  ;;  %v53_v19 = vsel %vm38_vm0, %v379_v15, 0.0  ;;  %v55_v25 = vsel %vm38_vm0, %v397_v21, 0.0  ;;  %v406_v26 = vld [vmem:[%s461_s0 + $0x18] sm:$0xff] }
   0x7   :  { %74 = vperm.xlu0 %263, %v29_v4   ;;  %v52_v18 = vsel %vm38_vm0, %v374_v14, 0.0  ;;  %v41_v22 = vadd.f32 %v40_v17, %v39_v16  ;;  %v411_v27 = vld [vmem:[%s461_s0 + $0x38] sm:$0xff]  ;;  %v44_v30 = vsel %vm38_vm0, %v406_v26, 0.0 }
   0x8   :  { %v54_v23 = vadd.f32 %v53_v19, %v52_v18  ;;  %v57_v31 = vsel %vm38_vm0, %v411_v27, 0.0 }
   0x9   :  { %v43_v28 = vadd.f32 %v42_v24, %v41_v22 }
   0xa   :  { %98 = vperm.xlu1 %264, %v33_v5   ;;  %v56_v29 = vadd.f32 %v55_v25, %v54_v23 }
   0xb   :  { %93 = vperm.xlu0 %263, %v32_v6   ;;  %v45_v32 = vadd.f32 %v44_v30, %v43_v28 }
   0xc   :  { %v58_v33 = vadd.f32 %v57_v31, %v56_v29 }
   0xd   :  { %v46_v34 = vrot.slane %v45_v32, 4 }
   0xe   :  { %124 = vperm.xlu1 %264, %v35_v7   ;;  %v59_v35 = vrot.slane %v58_v33, 4 }
   0xf   :  { %119 = vperm.xlu0 %263, %v34_v8   ;;  %v47_v36 = vadd.f32 %v46_v34, %v45_v32 }
  0x10   :  { %v60_v37 = vadd.f32 %v59_v35, %v58_v33 }
  0x11   :  { %v48_v38 = vrot.slane %v47_v36, 2 }
  0x12   :  { %134 = vperm.xlu1 %264, %v37_v9   ;;  %v61_v39 = vrot.slane %v60_v37, 2 }
  0x13   :  { %129 = vperm.xlu0 %263, %v36_v10   ;;  %v49_v40 = vadd.f32 %v48_v38, %v47_v36 }
  0x14   :  { %v62_v41 = vadd.f32 %v61_v39, %v60_v37 }
  0x15   :  { %v50_v42 = vrot.slane %v49_v40, 1 }
  0x16   :  { %266 = vset.pattern.permute.xlu1 %v300_v11  ;;  %v63_v43 = vrot.slane %v62_v41, 1 }
  0x17   :  { %265 = vset.pattern.permute.xlu0 %v300_v11  ;;  %150 = vperm.xlu1 %266, %v31_v3   ;;  %v51_v44 = vadd.f32 %v50_v42, %v49_v40 }
  0x18   :  { %146 = vperm.xlu0 %265, %v30_v1   ;;  %v64_v45 = vadd.f32 %v63_v43, %v62_v41  ;;  %v163_v1 = vsub.s32 1, %v102_v53 }
  0x1b   :  { %154 = vperm.xlu1 %266, %v32_v6  }
  0x1c   :  { %158 = vperm.xlu0 %265, %v33_v5  }
  0x81   :  { %v84_v46 = vpop.permute.xlu1 %83 }
  0x82   :  { %v68_v47 = vpop.permute.xlu0 %67 }
  0x83   :  { %v70_v49 = vmul.f32 %v68_v47, %v51_v44  ;;  %v71_v50 = vmul.f32 %v68_v47, %v64_v45 }
  0x85   :  { %v89_v51 = vpop.permute.xlu1 %88 }
  0x86   :  { %v75_v52 = vpop.permute.xlu0 %74 }
  0x87   :  { %v77_v54 = vadd.f32 %v75_v52, %v70_v49  ;;  %v78_v55 = vadd.f32 %v75_v52, %v71_v50 }
  0x89   :  { %v99_v56 = vpop.permute.xlu1 %98  ;;  %v79_v59 = vmax.f32 %v77_v54, 0.0  ;;  %v80_v60 = vmax.f32 %v78_v55, 0.0 }
  0x8a   :  { %v94_v57 = vpop.permute.xlu0 %93 }
  0x8b   :  { %v104_v63 = vrot.slane %v79_v59, %v103_v58  ;;  %v108_v0 = vrot.slane %v80_v60, %v103_v58  ;;  %v164_v8 = vrot.slane %v79_v59, %v163_v1  ;;  %v168_v9 = vrot.slane %v80_v60, %v163_v1 }
  0x8d   :  { %v125_v61 = vpop.permute.xlu1 %124  ;;  %v110_v4 = vmul.f32 %v104_v63, %v89_v51  ;;  %v114_v5 = vmul.f32 %v108_v0, %v89_v51  ;;  %v109_v6 = vmul.f32 %v104_v63, %v84_v46  ;;  %v113_v7 = vmul.f32 %v108_v0, %v84_v46 }
  0x8e   :  { %v120_v62 = vpop.permute.xlu0 %119  ;;  %v112_v28 = vmul.f32 %v104_v63, %v99_v56  ;;  %v116_v29 = vmul.f32 %v108_v0, %v99_v56  ;;  %v111_v30 = vmul.f32 %v104_v63, %v94_v57  ;;  %v115_v31 = vmul.f32 %v108_v0, %v94_v57 }
  0x8f   :  { %v138_v10 = vadd.f32 %v125_v61, %v110_v4  ;;  %v142_v11 = vadd.f32 %v125_v61, %v114_v5  ;;  %v137_v16 = vadd.f32 %v120_v62, %v109_v6  ;;  %v141_v17 = vadd.f32 %v120_v62, %v113_v7 }
  0x91   :  { %v135_v2 = vpop.permute.xlu1 %134 }
  0x92   :  { %v130_v3 = vpop.permute.xlu0 %129  ;;  %v140_v36 = vadd.f32 %v135_v2, %v112_v28  ;;  %v144_v37 = vadd.f32 %v135_v2, %v116_v29 }
  0x93   :  { %v139_v38 = vadd.f32 %v130_v3, %v111_v30  ;;  %v143_v39 = vadd.f32 %v130_v3, %v115_v31 }
  0x96   :  { %v151_v18 = vpop.permute.xlu1 %150 }
  0x97   :  { %v147_v19 = vpop.permute.xlu0 %146  ;;  %v170_v22 = vmul.f32 %v164_v8, %v151_v18  ;;  %v174_v23 = vmul.f32 %v168_v9, %v151_v18 }
  0x98   :  { %v169_v24 = vmul.f32 %v164_v8, %v147_v19  ;;  %v173_v25 = vmul.f32 %v168_v9, %v147_v19 }
  0x99   :  { %v178_v32 = vadd.f32 %v170_v22, %v138_v10  ;;  %v182_v33 = vadd.f32 %v174_v23, %v142_v11 }
  0x9a   :  { %v177_v34 = vadd.f32 %v169_v24, %v137_v16  ;;  %v181_v35 = vadd.f32 %v173_v25, %v141_v17  ;;  %v155_v40 = vpop.permute.xlu1 %154 }
  0x9b   :  { %v159_v41 = vpop.permute.xlu0 %158  ;;  %v254_v42 = vmul.f32 -1.442695, %v178_v32  ;;  %v258_v43 = vmul.f32 -1.442695, %v182_v33  ;;  %v171_v45 = vmul.f32 %v164_v8, %v155_v40  ;;  %v175_v47 = vmul.f32 %v168_v9, %v155_v40 }
  0x9c   :  { %v253_v44 = vmul.f32 -1.442695, %v177_v34  ;;  %v257_v46 = vmul.f32 -1.442695, %v181_v35  ;;  %v172_v48 = vmul.f32 %v164_v8, %v159_v41  ;;  %v176_v49 = vmul.f32 %v168_v9, %v159_v41 }
  0x9d   :  { %267 = vpow2.f32 %v254_v42  ;;  %v179_v50 = vadd.f32 %v171_v45, %v139_v38  ;;  %v183_v51 = vadd.f32 %v175_v47, %v143_v39 }
  0x9e   :  { %269 = vpow2.f32 %v258_v43  ;;  %v180_v52 = vadd.f32 %v172_v48, %v140_v36  ;;  %v184_v53 = vadd.f32 %v176_v49, %v144_v37 }
  0x9f   :  { %271 = vpow2.f32 %v253_v44  ;;  %v255_v54 = vmul.f32 -1.442695, %v179_v50  ;;  %v259_v55 = vmul.f32 -1.442695, %v183_v51 }
  0xa0   :  { %273 = vpow2.f32 %v257_v46  ;;  %v256_v56 = vmul.f32 -1.442695, %v180_v52  ;;  %v260_v57 = vmul.f32 -1.442695, %v184_v53 }
  0xa1   :  { %275 = vpow2.f32 %v255_v54 }
  0xa2   :  { %277 = vpow2.f32 %v259_v55 }
  0xa3   :  { %279 = vpow2.f32 %v256_v56 }
  0xa4   :  { %281 = vpow2.f32 %v260_v57 }
  0xa7   :  { %v268_v58 = vpop.eup %267 }
  0xa8   :  { %v270_v59 = vpop.eup %269  ;;  %v210_v60 = vadd.f32 1.0, %v268_v58 }
  0xa9   :  { %v272_v61 = vpop.eup %271  ;;  %v214_v62 = vadd.f32 1.0, %v270_v59 }
  0xaa   :  { %v274_v63 = vpop.eup %273  ;;  %283 = vrcp.f32 %v210_v60  ;;  %v209_v0 = vadd.f32 1.0, %v272_v61 }
  0xab   :  { %v276_v1 = vpop.eup %275  ;;  %285 = vrcp.f32 %v214_v62  ;;  %v213_v2 = vadd.f32 1.0, %v274_v63 }
  0xac   :  { %v278_v3 = vpop.eup %277  ;;  %287 = vrcp.f32 %v209_v0  ;;  %v211_v4 = vadd.f32 1.0, %v276_v1 }
  0xad   :  { %v280_v5 = vpop.eup %279  ;;  %289 = vrcp.f32 %v213_v2  ;;  %v215_v6 = vadd.f32 1.0, %v278_v3 }
  0xae   :  { %v282_v7 = vpop.eup %281  ;;  %291 = vrcp.f32 %v211_v4  ;;  %v212_v8 = vadd.f32 1.0, %v280_v5 }
  0xaf   :  { %293 = vrcp.f32 %v215_v6  ;;  %v216_v9 = vadd.f32 1.0, %v282_v7 }
  0xb0   :  { %295 = vrcp.f32 %v212_v8 }
  0xb1   :  { %297 = vrcp.f32 %v216_v9 }
  0xb4   :  { %v284_v10 = vpop.eup %283 }
  0xb5   :  { %v286_v11 = vpop.eup %285  ;;  %v234_v16 = vmul.f32 %v284_v10, %v369_v13 }
  0xb6   :  { %v288_v17 = vpop.eup %287  ;;  %v238_v18 = vmul.f32 %v286_v11, %v379_v15 }
  0xb7   :  { %v290_v19 = vpop.eup %289  ;;  %242 = vst.msk [vmem:[%s462_s5 + $0x8] sm:$0xff] %vm38_vm0, %v234_v16  ;;  %v233_v22 = vmul.f32 %v288_v17, %v364_v12 }
  0xb8   :  { %v292_v23 = vpop.eup %291  ;;  %246 = vst.msk [vmem:[%s462_s5 + $0x28] sm:$0xff] %vm38_vm0, %v238_v18  ;;  %v237_v24 = vmul.f32 %v290_v19, %v374_v14 }
  0xb9   :  { %v294_v13 = vpop.eup %293  ;;  %241 = vst.msk [vmem:[%s462_s5] sm:$0xff] %vm38_vm0, %v233_v22  ;;  %v235_v15 = vmul.f32 %v292_v23, %v392_v20 }
  0xba   :  { %v296_v25 = vpop.eup %295  ;;  %245 = vst.msk [vmem:[%s462_s5 + $0x20] sm:$0xff] %vm38_vm0, %v237_v24  ;;  %v239_v12 = vmul.f32 %v294_v13, %v397_v21 }
  0xbb   :  { %v298_v28 = vpop.eup %297  ;;  %243 = vst.msk [vmem:[%s462_s5 + $0x10] sm:$0xff] %vm38_vm0, %v235_v15  ;;  %v236_v14 = vmul.f32 %v296_v25, %v406_v26 }
  0xbc   :  { %247 = vst.msk [vmem:[%s462_s5 + $0x30] sm:$0xff] %vm38_vm0, %v239_v12  ;;  %v240_v20 = vmul.f32 %v298_v28, %v411_v27 }
  0xbd   :  { %244 = vst.msk [vmem:[%s462_s5 + $0x18] sm:$0xff] %vm38_vm0, %v236_v14 }
  0xbe   :  { %248 = vst.msk [vmem:[%s462_s5 + $0x38] sm:$0xff] %vm38_vm0, %v240_v20 }

</bundles_post_ra>
